<compile_context>
chip_gen: v5e
topology: v5e:2x2
jax: 0.10.0
libtpu: 0.0.40
codegen_flags: <defaults>
</compile_context>

<pallas_src>
import functools

import jax
import jax.numpy as jnp
from jax.experimental import pallas as pl
from jax.experimental.pallas import tpu as pltpu

_OUT_LANES = 128  # lane-dense output slab width
_H_PAD = 128      # padded hidden width (fully (8,128)-aligned second matmul)


def _round_up(n, m):
    return -(-n // m) * m


def _proposal_kernel(x_ref, w1_ref, b1_ref, w2_ref, b2_ref, priors_ref, out_ref, *, K):
    B = out_ref.shape[0]
    W = out_ref.shape[1]  # 128

    # ---- fused feed-forward (MXU, bf16 operands, f32 accumulation) ----
    h = jnp.dot(x_ref[...], w1_ref[...], preferred_element_type=jnp.float32) + b1_ref[...]
    h = jnp.maximum(h, 0.0)                                               # ReLU
    y = jnp.dot(h.astype(w2_ref.dtype), w2_ref[...],
                preferred_element_type=jnp.float32) + b2_ref[...]         # (B, W); lanes >= 3K are 0

    # ---- head transforms (all f32, lane-masked; no sub-vreg slicing of the MXU output) ----
    lane = jax.lax.broadcasted_iota(jnp.int32, (B, W), 1)
    is_mean = lane < K
    is_std = jnp.logical_and(lane >= K, lane < 2 * K)
    is_coef = jnp.logical_and(lane >= 2 * K, lane < 3 * K)

    pm = priors_ref[:, 0:1]   # (B, 1) prior mean   -> broadcasts over lanes
    ps = priors_ref[:, 1:2]   # (B, 1) prior stddev -> broadcasts over lanes

    means = pm + y * ps                       # valid on lanes [0, K)
    stddevs = jnp.exp(y) * ps                 # valid on lanes [K, 2K)

    # numerically-stable softmax over the coefficient lanes only
    c_max = jnp.max(jnp.where(is_coef, y, -jnp.inf), axis=1, keepdims=True)
    e = jnp.where(is_coef, jnp.exp(y - c_max), 0.0)
    inv = pl.reciprocal(jnp.sum(e, axis=1, keepdims=True), approx=False)
    coeffs = e * inv                          # zero outside [2K, 3K)

    # single unmasked lane-dense store: [means | stddevs | coeffs | zeros]
    out_ref[...] = jnp.where(is_mean, means, jnp.where(is_std, stddevs, coeffs))


def proposal_truncated_normal_normal_mixture(x, params, prior_means, prior_stddevs,
                                             prior_low, prior_high, mixture_components=10):
    """Forward pass. Returns (means, stddevs, coeffs, low, high), each (B, K) float32."""
    B = x.shape[0]
    K = mixture_components
    assert 3 * K <= _OUT_LANES
    x2 = x.reshape(B, -1).astype(jnp.float32)
    D = x2.shape[1]

    w1 = params["w1"].astype(jnp.float32)   # (D, H)
    b1 = params["b1"].astype(jnp.float32)   # (H,)
    w2 = params["w2"].astype(jnp.float32)   # (H, 3K)
    b2 = params["b2"].astype(jnp.float32)   # (3K,)
    H = w1.shape[1]
    assert H <= _H_PAD

    # Zero-pad every dimension to MXU / vreg-friendly sizes (all padding is exact, see header).
    B_pad = _round_up(B, 8)
    D_pad = _round_up(D, 128)
    x2 = jnp.pad(x2, ((0, B_pad - B), (0, D_pad - D)))
    w1 = jnp.pad(w1, ((0, D_pad - D), (0, _H_PAD - H)))
    b1 = jnp.pad(b1, ((0, _H_PAD - H),))
    w2 = jnp.pad(w2, ((0, _H_PAD - H), (0, _OUT_LANES - 3 * K)))
    b2 = jnp.pad(b2, ((0, _OUT_LANES - 3 * K),))

    # bf16 matmul operands (f32 accumulation in-kernel); biases / priors stay f32.
    x_bf = x2.astype(jnp.bfloat16)
    w1_bf = w1.astype(jnp.bfloat16)
    w2_bf = w2.astype(jnp.bfloat16)
    b1r = b1.reshape(1, _H_PAD)
    b2r = b2.reshape(1, _OUT_LANES)
    priors = jnp.stack([prior_means.reshape(B), prior_stddevs.reshape(B)],
                       axis=1).astype(jnp.float32)            # (B, 2): [prior_mean, prior_stddev]
    priors = jnp.pad(priors, ((0, B_pad - B), (0, 0)))

    ins = [x_bf, w1_bf, b1r, w2_bf, b2r, priors]
    slab = pl.pallas_call(
        functools.partial(_proposal_kernel, K=K),
        in_specs=[pl.BlockSpec(memory_space=pltpu.MemorySpace.VMEM) for _ in ins],
        out_specs=pl.BlockSpec(memory_space=pltpu.MemorySpace.VMEM),
        out_shape=jax.ShapeDtypeStruct((B_pad, _OUT_LANES), jnp.float32),
    )(*ins)

    slab = slab[:B]
    means = slab[:, :K]
    stddevs = slab[:, K:2 * K]
    coeffs = slab[:, 2 * K:3 * K]
    # low/high involve zero compute -> plain broadcasts in the wrapper (no kernel I/O).
    low = jnp.broadcast_to(prior_low.reshape(B, 1).astype(jnp.float32), (B, K))
    high = jnp.broadcast_to(prior_high.reshape(B, 1).astype(jnp.float32), (B, K))
    return means, stddevs, coeffs, low, high


def init_params(key, input_dim, mixture_components=10):
    """Deterministic synthetic init for the 2-layer EmbeddingFeedForward."""
    K = mixture_components
    out_dim = 3 * K
    hidden_dim = (input_dim + out_dim) // 2      # pyprob's EmbeddingFeedForward default
    k1, k2, k3, k4 = jax.random.split(key, 4)
    return {
        "w1": jax.random.normal(k1, (input_dim, hidden_dim), jnp.float32) * 0.1,
        "b1": jax.random.normal(k2, (hidden_dim,), jnp.float32) * 0.01,
        "w2": jax.random.normal(k3, (hidden_dim, out_dim), jnp.float32) * 0.1,
        "b2": jax.random.normal(k4, (out_dim,), jnp.float32) * 0.01,
    }


if __name__ == "__main__":
    B = 8            # batch
    D = 32           # flattened input feature dim (input_shape = (32,))
    K = 10           # mixture_components

    key = jax.random.PRNGKey(0)
    k_x, k_p, k_pm, k_ps = jax.random.split(key, 4)

    params = init_params(k_p, D, K)
    x = jax.random.normal(k_x, (B, D), jnp.float32)

    # Synthetic prior_variables: one TruncatedNormal prior per batch element (scalar each),
    # i.e. stacked means/stddevs/low/high of shape (B,) -> viewed (B, 1) -> expanded to (B, K).
    prior_means = jax.random.normal(k_pm, (B,), jnp.float32)
    prior_stddevs = jnp.exp(0.2 * jax.random.normal(k_ps, (B,), jnp.float32))
    prior_low = prior_means - 2.0
    prior_high = prior_means + 2.0

    means, stddevs, coeffs, low, high = proposal_truncated_normal_normal_mixture(
        x, params, prior_means, prior_stddevs, prior_low, prior_high, mixture_components=K)
    jax.block_until_ready((means, stddevs, coeffs, low, high))

    # Light sanity checks: shapes, softmax normalization, positivity/finiteness.
    for t in (means, stddevs, coeffs, low, high):
        assert t.shape == (B, K)
    assert bool(jnp.allclose(jnp.sum(coeffs, axis=1), 1.0, atol=1e-5))
    assert bool(jnp.all(stddevs > 0.0)) and bool(jnp.all(jnp.isfinite(means)))

    print("KERNEL_OK")
</pallas_src>

<mosaic_0001>
module attributes {stable_mosaic.version = 11 : i64} {
  func.func @_proposal_kernel(%arg0: memref<8x128xbf16, #tpu.memory_space<vmem>>, %arg1: memref<128x128xbf16, #tpu.memory_space<vmem>>, %arg2: memref<1x128xf32, #tpu.memory_space<vmem>>, %arg3: memref<128x128xbf16, #tpu.memory_space<vmem>>, %arg4: memref<1x128xf32, #tpu.memory_space<vmem>>, %arg5: memref<8x2xf32, #tpu.memory_space<vmem>>, %arg6: memref<8x128xf32, #tpu.memory_space<vmem>>) attributes {dimension_semantics = [], scalar_prefetch = 0 : i64, scratch_operands = 0 : i64, tpu.core_type = #tpu.core_type<tc>} {
    %c0 = arith.constant 0 : index
    %c0_0 = arith.constant 0 : index
    %0 = vector.load %arg0[%c0, %c0_0] : memref<8x128xbf16, #tpu.memory_space<vmem>>, vector<8x128xbf16>
    %c0_1 = arith.constant 0 : index
    %c0_2 = arith.constant 0 : index
    %1 = vector.load %arg1[%c0_1, %c0_2] : memref<128x128xbf16, #tpu.memory_space<vmem>>, vector<128x128xbf16>
    %cst = arith.constant dense<0.000000e+00> : vector<8x128xf32>
    %2 = tpu.matmul %0, %1, %cst {dimension_numbers = #tpu.dot_dimension_numbers<[1], [0], [0], [1], [0, 0, 1, 1], [], []>} : vector<8x128xbf16>, vector<128x128xbf16>, vector<8x128xf32> -> vector<8x128xf32>
    %c0_3 = arith.constant 0 : index
    %c0_4 = arith.constant 0 : index
    %3 = vector.load %arg2[%c0_3, %c0_4] : memref<1x128xf32, #tpu.memory_space<vmem>>, vector<1x128xf32>
    %4 = vector.broadcast %3 : vector<1x128xf32> to vector<8x128xf32>
    %5 = arith.addf %2, %4 : vector<8x128xf32>
    %cst_5 = arith.constant 0.000000e+00 : f32
    %6 = vector.broadcast %cst_5 : f32 to vector<8x128xf32>
    %7 = arith.maximumf %5, %6 : vector<8x128xf32>
    %8 = arith.truncf %7 : vector<8x128xf32> to vector<8x128xbf16>
    %c0_6 = arith.constant 0 : index
    %c0_7 = arith.constant 0 : index
    %9 = vector.load %arg3[%c0_6, %c0_7] : memref<128x128xbf16, #tpu.memory_space<vmem>>, vector<128x128xbf16>
    %cst_8 = arith.constant dense<0.000000e+00> : vector<8x128xf32>
    %10 = tpu.matmul %8, %9, %cst_8 {dimension_numbers = #tpu.dot_dimension_numbers<[1], [0], [0], [1], [0, 0, 1, 1], [], []>} : vector<8x128xbf16>, vector<128x128xbf16>, vector<8x128xf32> -> vector<8x128xf32>
    %c0_9 = arith.constant 0 : index
    %c0_10 = arith.constant 0 : index
    %11 = vector.load %arg4[%c0_9, %c0_10] : memref<1x128xf32, #tpu.memory_space<vmem>>, vector<1x128xf32>
    %12 = vector.broadcast %11 : vector<1x128xf32> to vector<8x128xf32>
    %13 = arith.addf %10, %12 : vector<8x128xf32>
    %14 = tpu.iota {dimensions = array<i32: 1>} : vector<8x128xi32>
    %c10_i32 = arith.constant 10 : i32
    %15 = vector.broadcast %c10_i32 : i32 to vector<8x128xi32>
    %16 = arith.cmpi slt, %14, %15 : vector<8x128xi32>
    %c10_i32_11 = arith.constant 10 : i32
    %17 = vector.broadcast %c10_i32_11 : i32 to vector<8x128xi32>
    %18 = arith.cmpi sge, %14, %17 : vector<8x128xi32>
    %c20_i32 = arith.constant 20 : i32
    %19 = vector.broadcast %c20_i32 : i32 to vector<8x128xi32>
    %20 = arith.cmpi slt, %14, %19 : vector<8x128xi32>
    %21 = arith.andi %18, %20 : vector<8x128xi1>
    %c20_i32_12 = arith.constant 20 : i32
    %22 = vector.broadcast %c20_i32_12 : i32 to vector<8x128xi32>
    %23 = arith.cmpi sge, %14, %22 : vector<8x128xi32>
    %c30_i32 = arith.constant 30 : i32
    %24 = vector.broadcast %c30_i32 : i32 to vector<8x128xi32>
    %25 = arith.cmpi slt, %14, %24 : vector<8x128xi32>
    %26 = arith.andi %23, %25 : vector<8x128xi1>
    %c0_13 = arith.constant 0 : index
    %c0_14 = arith.constant 0 : index
    %27 = vector.load %arg5[%c0_13, %c0_14] : memref<8x2xf32, #tpu.memory_space<vmem>>, vector<8x1xf32>
    %c0_15 = arith.constant 0 : index
    %c1 = arith.constant 1 : index
    %28 = vector.load %arg5[%c0_15, %c1] : memref<8x2xf32, #tpu.memory_space<vmem>>, vector<8x1xf32>
    %29 = vector.broadcast %28 : vector<8x1xf32> to vector<8x128xf32>
    %30 = arith.mulf %13, %29 : vector<8x128xf32>
    %31 = vector.broadcast %27 : vector<8x1xf32> to vector<8x128xf32>
    %32 = arith.addf %31, %30 : vector<8x128xf32>
    %33 = math.exp %13 : vector<8x128xf32>
    %34 = vector.broadcast %28 : vector<8x1xf32> to vector<8x128xf32>
    %35 = arith.mulf %33, %34 : vector<8x128xf32>
    %cst_16 = arith.constant 0xFF800000 : f32
    %36 = vector.broadcast %cst_16 : f32 to vector<8x128xf32>
    %37 = arith.select %26, %13, %36 : vector<8x128xi1>, vector<8x128xf32>
    %cst_17 = arith.constant dense<0xFF800000> : vector<8xf32>
    %38 = vector.multi_reduction <maximumf>, %37, %cst_17 [1] : vector<8x128xf32> to vector<8xf32>
    %39 = vector.shape_cast %38 : vector<8xf32> to vector<8x1xf32>
    %40 = vector.broadcast %39 : vector<8x1xf32> to vector<8x128xf32>
    %41 = arith.subf %13, %40 : vector<8x128xf32>
    %42 = math.exp %41 : vector<8x128xf32>
    %cst_18 = arith.constant 0.000000e+00 : f32
    %43 = vector.broadcast %cst_18 : f32 to vector<8x128xf32>
    %44 = arith.select %26, %42, %43 : vector<8x128xi1>, vector<8x128xf32>
    %cst_19 = arith.constant dense<0.000000e+00> : vector<8xf32>
    %45 = vector.multi_reduction <add>, %44, %cst_19 [1] : vector<8x128xf32> to vector<8xf32>
    %46 = vector.shape_cast %45 : vector<8xf32> to vector<8x1xf32>
    %47 = tpu.reciprocal %46 : vector<8x1xf32> -> vector<8x1xf32>
    %48 = vector.broadcast %47 : vector<8x1xf32> to vector<8x128xf32>
    %49 = arith.mulf %44, %48 : vector<8x128xf32>
    %50 = arith.select %21, %35, %49 : vector<8x128xi1>, vector<8x128xf32>
    %51 = arith.select %16, %32, %50 : vector<8x128xi1>, vector<8x128xf32>
    %c0_20 = arith.constant 0 : index
    %c0_21 = arith.constant 0 : index
    %52 = vector.load %arg6[%c0_20, %c0_21] : memref<8x128xf32, #tpu.memory_space<vmem>>, vector<8x128xf32>
    tpu.vector_store %arg6[%c0_20, %c0_21], %51 {strides = array<i32>} : memref<8x128xf32, #tpu.memory_space<vmem>>, vector<8x128xf32>,
    return
  }
}

</mosaic_0001>

<bundles_post_ra>
// kernel: tpu_custom_call.1
= control target key start
LH: loop header
LB: loop body
LE: loop exit
PB: predicated region body
PF: predicated region fallthrough
CT: control target
= control target key end

     0   :  { %11 = vsyncpa [#allocation3], 0  ;;  %s529_s0 = inlined_call_operand.vmem [shape: bf16[8,128], index: 0, kind: input, shape index: {}]   ;;  %s530_s1 = inlined_call_operand.hbm [shape: bf16[128,128], index: 1, kind: input, shape index: {}]   ;;  %s531_s2 = inlined_call_operand.vmem [shape: f32[1,128], index: 2, kind: input, shape index: {}]   ;;  %s532_s3 = inlined_call_operand.hbm [shape: bf16[128,128], index: 3, kind: input, shape index: {}]   ;;  %s533_s4 = inlined_call_operand.vmem [shape: f32[1,128], index: 4, kind: input, shape index: {}]   ;;  %s534_s5 = inlined_call_operand.vmem [shape: f32[8,2], index: 5, kind: input, shape index: {}]   ;;  %s535_s6 = inlined_call_operand.hbm [shape: f32[8,128], index: 6, kind: output, shape index: {}]  }
   0x1   :  { %12 = vsyncpa [#allocation6], 0 }
   0x2   :  { %13 = vsyncpa [#allocation4], 0  ;;  %s20_s23 = sshll.u32 %s530_s1, 4  ;;  %s466_s24 = smov [#allocation2]   ;;  %s21_s23 = int_to_ptr.hbm [resolvable:$true] %s20_s23 }
   0x3   :  { %s22_s25 = sshll.u32 %s466_s24, 4  ;;  %s35_s28 = sshll.u32 %s532_s3, 4  ;;  %s23_s25 = int_to_ptr.vmem [resolvable:$true] %s22_s25  ;;  %s36_s28 = int_to_ptr.hbm [resolvable:$true] %s35_s28 }
   0x4   :  { %s467_s29 = smov 64   ;;  %s468_s30 = smov 4  }
   0x5   :  { %28 = dma.hbm_to_vmem [thread:$0]  %s21_s23, 1024, %s23_s25, [#allocation3], %s467_s29, %s467_s29, %s468_s30  }
   0x6   :  { %s469_s7 = smov [#allocation5]  }
   0x7   :  { %s37_s8 = sshll.u32 %s469_s7, 4  ;;  %s38_s8 = int_to_ptr.vmem [resolvable:$true] %s37_s8 }
   0x8   :  { %43 = dma.hbm_to_vmem [thread:$0]  %s36_s28, 1024, %s38_s8, [#allocation6], %s467_s29, %s467_s29, %s468_s30  }
   0x9   :  { %460 = dma.done.wait [#allocation3], 1024  }
   0xa   :  { %461 = vsyncadd [#allocation3], 4294966272 }
   0xb   :  { %462 = dma.done.wait [#allocation6], 1024  }
   0xc   :  { %463 = vsyncadd [#allocation6], 4294966272  ;;  %v361_v0 = vld [vmem:[#allocation2 + $0x38] sm:$0xff]  ;;  %v360_v1 = vld [vmem:[#allocation2 + $0x30] sm:$0xff]  ;;  %v470_v18 = vmov 1   ;;  %v471_v19 = vmov 0   ;;  %v221_v26 = vlaneseq }
   0xd   :  { %125 = vmatpush.bf16.msra.mxu0 %v361_v0  ;;  %v369_v2 = vld [vmem:[#allocation5 + $0x38] sm:$0xff]  ;;  %v368_v3 = vld [vmem:[#allocation5 + $0x30] sm:$0xff]  ;;  %v359_v4 = vld [vmem:[#allocation2 + $0x28] sm:$0xff]  ;;  %377 = vset.pattern.permute.xlu1 %v470_v18  ;;  %s279_s15 = sshll.u32 %s535_s6, 4  ;;  %s280_s15 = int_to_ptr.hbm [resolvable:$true] %s279_s15 }
   0xe   :  { %208 = vmatpush.bf16.msra.mxu1 %v369_v2  ;;  %v367_v5 = vld [vmem:[#allocation5 + $0x28] sm:$0xff]  ;;  %v358_v6 = vld [vmem:[#allocation2 + $0x20] sm:$0xff]  ;;  %v357_v8 = vld [vmem:[#allocation2 + $0x18] sm:$0xff]  ;;  %379 = vset.pattern.permute.xlu0 %v471_v19  ;;  %v222_v27 = vand.u32 127, %v221_v26 }
   0xf   :  { %v366_v7 = vld [vmem:[#allocation5 + $0x20] sm:$0xff]  ;;  %v365_v9 = vld [vmem:[#allocation5 + $0x18] sm:$0xff]  ;;  %v356_v10 = vld [vmem:[#allocation2 + $0x10] sm:$0xff] }
  0x10   :  { %v364_v11 = vld [vmem:[#allocation5 + $0x10] sm:$0xff]  ;;  %v355_v12 = vld [vmem:[#allocation2 + $0x8] sm:$0xff]  ;;  %v354_v13 = vld [vmem:[#allocation2] sm:$0xff]  ;;  %vm227_vm0 = vcmp.ge.s32.totalorder %v222_v27, 20  ;;  %vm228_vm1 = vcmp.lt.s32.totalorder %v222_v27, 30  ;;  %vm224_vm5 = vcmp.ge.s32.totalorder %v222_v27, 10 }
  0x11   :  { %126 = vmatpush.bf16.msra.mxu0 %v360_v1  ;;  %v56_v14 = vld [vmem:[%s529_s0] sm:$0xf]  ;;  %v363_v15 = vld [vmem:[#allocation5 + $0x8] sm:$0xff]  ;;  %vm229_vm2 = vmand %vm227_vm0, %vm228_vm1  ;;  %vm225_vm6 = vcmp.lt.s32.totalorder %v222_v27, 20  ;;  %vm223_vm10 = vcmp.lt.s32.totalorder %v222_v27, 10 }
  0x12   :  { %209 = vmatpush.bf16.msra.mxu1 %v368_v3  ;;  %v362_v16 = vld [vmem:[#allocation5] sm:$0xff]  ;;  %vm226_vm9 = vmand %vm224_vm5, %vm225_vm6 }
  0x13   :  { %v230_v17 = vld [vmem:[%s534_s5] sm:$0xff] }
  0x14   :  { %233 = vperm.xlu1 %377, %v230_v17   ;;  %v380_v20 = vld [vmem:[%s531_s2] ss:$0 sm:$0xff]  ;;  %s472_s2 = smov [#allocation7]  }
  0x15   :  { %127 = vmatpush.bf16.msra.mxu0 %v359_v4  ;;  %v381_v28 = vld [vmem:[%s533_s4] ss:$0 sm:$0xff]  ;;  %s277_s4 = sshll.u32 %s472_s2, 4  ;;  %s278_s4 = int_to_ptr.vmem [resolvable:$true] %s277_s4 }
  0x16   :  { %210 = vmatpush.bf16.msra.mxu1 %v367_v5 }
  0x19   :  { %128 = vmatpush.bf16.msra.mxu0 %v358_v6 }
  0x1a   :  { %211 = vmatpush.bf16.msra.mxu1 %v366_v7 }
  0x1c   :  { %378 = vset.pattern.permute.xlu1 %v471_v19 }
  0x1d   :  { %129 = vmatpush.bf16.msra.mxu0 %v357_v8  ;;  %238 = vperm.xlu1 %378, %v230_v17  }
  0x1e   :  { %212 = vmatpush.bf16.msra.mxu1 %v365_v9 }
  0x21   :  { %130 = vmatpush.bf16.msra.mxu0 %v356_v10 }
  0x22   :  { %213 = vmatpush.bf16.msra.mxu1 %v364_v11 }
  0x25   :  { %131 = vmatpush.bf16.msra.mxu0 %v355_v12 }
  0x26   :  { %214 = vmatpush.bf16.msra.mxu1 %v363_v15 }
  0x29   :  { %132 = vmatpush.bf16.msra.mxu0 %v354_v13 }
  0x2a   :  { %215 = vmatpush.bf16.msra.mxu1 %v362_v16 }
  0x2c   :  { %133 = vmatmul.bf16.vlgmr.msra.gmra.mxu0 %v56_v14 }
  0x86   :  { %v234_v40 = vpop.permute.xlu1 %233 }
  0x8f   :  { %v239_v51 = vpop.permute.xlu1 %238 }
  0xa9   :  { %v134_v21 = vpop.f32.mrf.mxu0 }
  0xaa   :  { %v135_v22 = vadd.f32 %v380_v20, %v134_v21 }
  0xac   :  { %v138_v23 = vmax.f32 %v135_v22, 0.0 }
  0xae   :  { %v139_v24 = vpack.c.bf16 %v138_v23, %v138_v23 }
  0xb0   :  { %216 = vmatmul.bf16.vlgmr.msra.gmra.mxu1 %v139_v24 }
  0xb1   :  { %v136_v25 = vpop.f32.mrf.mxu0 }
 0x12d   :  { %v217_v29 = vpop.f32.mrf.mxu1 }
 0x12e   :  { %v218_v30 = vadd.f32 %v381_v28, %v217_v29 }
 0x130   :  { %v245_v31 = vsel %vm229_vm2, %v218_v30, -inf  ;;  %v242_v39 = vmul.f32 1.442695, %v218_v30  ;;  %v236_v49 = vmul.f32 %v234_v40, %v218_v30 }
 0x131   :  { %246 = vmax.xlane.f32.xlu0 %v245_v31 }
 0x132   :  { %v241_v56 = vadd.f32 %v239_v51, %v236_v49 }
 0x135   :  { %v219_v32 = vpop.f32.mrf.mxu1 }
 0x1a4   :  { %v247_v33 = vpop.xlane.xlu0 %246 }
 0x1a5   :  { %v248_v34 = vsub.f32 %v218_v30, %v247_v33 }
 0x1a7   :  { %v249_v35 = vmul.f32 1.442695, %v248_v34 }
 0x1a9   :  { %382 = vpow2.f32 %v249_v35 }
 0x1af   :  { %v383_v36 = vpop.eup %382 }
 0x1b0   :  { %v251_v37 = vsel %vm229_vm2, %v383_v36, 0.0 }
 0x1b1   :  { %252 = vadd.xlane.f32.xlu0 %v251_v37 }
 0x224   :  { %v253_v38 = vpop.xlane.xlu0 %252 }
 0x225   :  { %384 = vrcp.f32 %v253_v38  ;;  %v265_v44 = vand.u32 2147483648, %v253_v38  ;;  %v263_v46 = vand.u32 2147483647, %v253_v38  ;;  %vm259_vm4 = vweird.f32 %v253_v38 }
 0x226   :  { %386 = vpow2.f32 %v242_v39 }
 0x227   :  { %v266_v50 = vor.u32 1.1754944e-38, %v265_v44  ;;  %vm264_vm8 = vcmp.eq.f32.partialorder %v263_v46, 8.507059e+37 }
 0x22b   :  { %v385_v41 = vpop.eup %384 }
 0x22c   :  { %v255_v42 = vmul.f32 %v385_v41, %v253_v38  ;;  %vm260_vm3 = vweird.f32 %v385_v41  ;;  %v387_v48 = vpop.eup %386 }
 0x22d   :  { %vm261_vm7 = vmor %vm259_vm4, %vm260_vm3  ;;  %v244_v55 = vmul.f32 %v387_v48, %v234_v40 }
 0x22e   :  { %v256_v43 = vsub.f32 1.0, %v255_v42 }
 0x230   :  { %v257_v45 = vmul.f32 %v385_v41, %v256_v43 }
 0x232   :  { %v258_v47 = vadd.f32 %v385_v41, %v257_v45 }
 0x234   :  { %v262_v52 = vsel %vm261_vm7, %v385_v41, %v258_v47 }
 0x235   :  { %v267_v53 = vsel %vm264_vm8, %v266_v50, %v262_v52 }
 0x236   :  { %v268_v54 = vmul.f32 %v267_v53, %v251_v37 }
 0x238   :  { %v269_v57 = vsel %vm226_vm9, %v244_v55, %v268_v54 }
 0x239   :  { %v270_v58 = vsel %vm223_vm10, %v241_v56, %v269_v57 }
 0x23a   :  { %271 = vst [vmem:[#allocation7] sm:$0xff] %v270_v58 }
 0x23b   :  { %282 = dma.vmem_to_hbm [thread:$0]  %s278_s4, 128, %s280_s15, [#allocation4]  }
 0x23c   :  { %464 = dma.done.wait [#allocation4], 128  }
 0x23d   :  { %465 = vsyncadd [#allocation4], 4294967168 }
 0x23e   :  { %287 = vsyncpa [#allocation3], 1 }
 0x23f   :  { %288 = vsyncpa [#allocation6], 1 }
 0x240   :  { %289 = vsyncpa [#allocation4], 1 }

</bundles_post_ra>
